<compile_context>
chip_gen: v7x
topology: tpu7x:2x2x1
jax: 0.10.0
libtpu: 0.0.40
codegen_flags: <defaults>
</compile_context>

<pallas_src>
import functools

import jax
import jax.numpy as jnp
from jax import lax
from jax.experimental import pallas as pl
from jax.experimental.pallas import tpu as pltpu

SMOOTH = 1e-05
LANES = 128
SUB_ROWS = 1024                       # rows per in-kernel accumulation chunk
TARGET_STEP_BYTES = 8 * 1024 * 1024   # combined (both inputs) HBM bytes per grid step
VMEM_LIMIT_BYTES = 32 * 1024 * 1024   # 2 inputs x 2 buffers x ~4 MiB blocks + headroom

_NATIVE_DTYPES = tuple(jnp.dtype(d) for d in
                       (jnp.float32, jnp.bfloat16, jnp.int8, jnp.uint8, jnp.int32))


def _dice_partial_kernel(x_ref, t_ref, out_ref, *, sub_rows, num_sub):
    """Per-block partial sums: out[0,0,:]=sum(x*t) per lane, out[0,1,:]=sum(x+t)."""

    def chunk_sums(xs, ts):
        xs = xs.astype(jnp.float32)
        ts = ts.astype(jnp.float32)
        inter = jnp.sum(xs * ts, axis=0, keepdims=True)   # (1, LANES), sublane-only reduce
        sums = jnp.sum(xs + ts, axis=0, keepdims=True)    # (1, LANES)
        return inter, sums

    if num_sub == 1:
        inter, sums = chunk_sums(x_ref[...], t_ref[...])
    else:
        def body(j, carry):
            acc_inter, acc_sums = carry
            off = pl.multiple_of(j * sub_rows, sub_rows)
            ci, cs = chunk_sums(x_ref[pl.ds(off, sub_rows), :],
                                t_ref[pl.ds(off, sub_rows), :])
            return acc_inter + ci, acc_sums + cs

        init = (jnp.zeros((1, LANES), jnp.float32),
                jnp.zeros((1, LANES), jnp.float32))
        inter, sums = lax.fori_loop(0, num_sub, body, init, unroll=True)

    out_ref[...] = jnp.concatenate([inter, sums], axis=0)[None]  # (1, 2, LANES)


def _block_partials(x2, t2, tile_rows, sub_rows, num_blocks):
    kernel = functools.partial(_dice_partial_kernel,
                               sub_rows=sub_rows,
                               num_sub=tile_rows // sub_rows)
    return pl.pallas_call(
        kernel,
        out_shape=jax.ShapeDtypeStruct((num_blocks, 2, LANES), jnp.float32),
        grid_spec=pltpu.PrefetchScalarGridSpec(
            num_scalar_prefetch=0,
            grid=(num_blocks,),
            in_specs=[
                pl.BlockSpec((tile_rows, LANES), lambda i: (i, 0)),
                pl.BlockSpec((tile_rows, LANES), lambda i: (i, 0)),
            ],
            out_specs=pl.BlockSpec((1, 2, LANES), lambda i: (i, 0, 0)),
        ),
        compiler_params=pltpu.CompilerParams(
            # Independent blocks -> both TensorCores can be used on v7x.
            dimension_semantics=("parallel",),
            vmem_limit_bytes=VMEM_LIMIT_BYTES,
        ),
    )(x2, t2)


def _prep_flat(a):
    a = jnp.ravel(a)  # free reshape for contiguous inputs
    if a.dtype == jnp.dtype(jnp.bool_):
        return a.astype(jnp.int8)      # 1-byte stream; f32 cast happens on the VPU
    if a.dtype in _NATIVE_DTYPES:
        return a                       # stream natively; cast in-kernel
    return a.astype(jnp.float32)       # rare fallback (f64/f16/etc.)


def dice_loss(inp, target):
    """Pallas TPU implementation of DiceLoss.forward(input, target) -> scalar f32."""
    x = _prep_flat(inp)
    t = _prep_flat(target)
    n = x.shape[0]

    n128 = (n // LANES) * LANES
    rows = n128 // LANES

    inter = jnp.float32(0.0)
    total = jnp.float32(0.0)

    if rows > 0:
        # No-op when n is lane aligned; reshape of a contiguous array is free.
        x2 = x[:n128].reshape(rows, LANES)
        t2 = t[:n128].reshape(rows, LANES)

        if rows >= 2 * SUB_ROWS:
            # Dtype-aware block sizing: ~TARGET_STEP_BYTES of HBM traffic per step.
            bytes_per_row = LANES * (x2.dtype.itemsize + t2.dtype.itemsize)
            budget_rows = max(
                SUB_ROWS,
                (TARGET_STEP_BYTES // bytes_per_row) // SUB_ROWS * SUB_ROWS)
            # Keep at least 2 blocks so both TensorCores get work on v7x.
            tile_rows = min(budget_rows, (rows // (2 * SUB_ROWS)) * SUB_ROWS)
            sub_rows = SUB_ROWS
        else:
            tile_rows = rows   # single block == full array dims (no (8,128) issue)
            sub_rows = rows

        num_blocks = rows // tile_rows       # full blocks only -> no in-kernel masking
        bulk_rows = num_blocks * tile_rows

        partials = _block_partials(x2, t2, tile_rows, sub_rows, num_blocks)
        inter = jnp.sum(partials[:, 0, :], dtype=jnp.float32)
        total = jnp.sum(partials[:, 1, :], dtype=jnp.float32)

        if bulk_rows != rows:
            # Remainder (< tile_rows) rows: plain JAX; the slice fuses into the reduce.
            xr = x2[bulk_rows:].astype(jnp.float32)
            tr = t2[bulk_rows:].astype(jnp.float32)
            inter = inter + jnp.sum(xr * tr)
            total = total + jnp.sum(xr + tr)

    if n128 != n:
        # Ragged tail (< 128 elements): negligible, done in plain JAX.
        tx = x[n128:].astype(jnp.float32)
        tt = t[n128:].astype(jnp.float32)
        inter = inter + jnp.sum(tx * tt)
        total = total + jnp.sum(tx) + jnp.sum(tt)

    return 1.0 - (2.0 * inter + SMOOTH) / (total + SMOOTH)


def dice_loss_ref(inp, target):
    iflat = jnp.ravel(inp).astype(jnp.float32)
    tflat = jnp.ravel(target).astype(jnp.float32)
    inter = jnp.sum(iflat * tflat)
    return 1.0 - (2.0 * inter + SMOOTH) / (jnp.sum(iflat) + jnp.sum(tflat) + SMOOTH)


if __name__ == "__main__":
    key = jax.random.PRNGKey(0)
    k1, k2, k3, k4, k5, k6, k7 = jax.random.split(key, 7)

    # 1) Segmentation-style usage: prediction probs & binary target, NCHW.
    x = jax.random.uniform(k1, (2, 4, 16, 16), dtype=jnp.float32)
    tgt = (jax.random.uniform(k2, (2, 4, 16, 16)) > 0.5).astype(jnp.float32)
    loss = jax.block_until_ready(dice_loss(x, tgt))
    ref = jax.block_until_ready(dice_loss_ref(x, tgt))
    assert jnp.allclose(loss, ref, rtol=1e-5, atol=1e-5), (loss, ref)

    # 2) Non-lane-aligned shape: exercises the JAX ragged-tail path.
    x2 = jax.random.uniform(k3, (1, 2, 23, 23), dtype=jnp.float32)
    t2 = (jax.random.uniform(k4, (1, 2, 23, 23)) > 0.5).astype(jnp.float32)
    loss2 = jax.block_until_ready(dice_loss(x2, t2))
    ref2 = jax.block_until_ready(dice_loss_ref(x2, t2))
    assert jnp.allclose(loss2, ref2, rtol=1e-5, atol=1e-5), (loss2, ref2)

    # 3) Moderate input: multi-block grid + remainder rows + ragged tail.
    x3 = jax.random.uniform(k5, (2, 4, 188, 189), dtype=jnp.float32)
    t3 = (jax.random.uniform(k6, (2, 4, 188, 189)) > 0.5).astype(jnp.float32)
    loss3 = jax.block_until_ready(dice_loss(x3, t3))
    ref3 = jax.block_until_ready(dice_loss_ref(x3, t3))
    assert jnp.allclose(loss3, ref3, rtol=1e-4, atol=1e-5), (loss3, ref3)

    # 4) bf16 prediction with f32 target: native-dtype streaming, in-kernel cast.
    xb = jax.random.uniform(k7, (2, 4, 16, 16), dtype=jnp.float32).astype(jnp.bfloat16)
    lossb = jax.block_until_ready(dice_loss(xb, tgt))
    refb = jax.block_until_ready(dice_loss_ref(xb, tgt))
    assert jnp.allclose(lossb, refb, rtol=1e-5, atol=1e-5), (lossb, refb)

    print("KERNEL_OK")
</pallas_src>

<mosaic_0001>
module attributes {stable_mosaic.version = 11 : i64} {
  func.func @_dice_partial_kernel(%arg0: i32, %arg1: memref<16x128xf32, #tpu.memory_space<vmem>>, %arg2: memref<16x128xf32, #tpu.memory_space<vmem>>, %arg3: memref<1x2x128xf32, #tpu.memory_space<vmem>>) attributes {dimension_semantics = [#tpu.dimension_semantics<parallel>], iteration_bounds = array<i64: 1>, scalar_prefetch = 0 : i64, scratch_operands = 0 : i64, tpu.core_type = #tpu.core_type<tc>, window_params = [{transform_indices = @transform_0, window_bounds = array<i64: 16, 128>}, {transform_indices = @transform_1, window_bounds = array<i64: 16, 128>}, {transform_indices = @transform_2, window_bounds = array<i64: 1, 2, 128>}]} {
    %c0 = arith.constant 0 : index
    %c0_0 = arith.constant 0 : index
    %0 = vector.load %arg1[%c0, %c0_0] : memref<16x128xf32, #tpu.memory_space<vmem>>, vector<16x128xf32>
    %c0_1 = arith.constant 0 : index
    %c0_2 = arith.constant 0 : index
    %1 = vector.load %arg2[%c0_1, %c0_2] : memref<16x128xf32, #tpu.memory_space<vmem>>, vector<16x128xf32>
    %2 = arith.mulf %0, %1 : vector<16x128xf32>
    %cst = arith.constant dense<0.000000e+00> : vector<128xf32>
    %3 = vector.multi_reduction <add>, %2, %cst [0] : vector<16x128xf32> to vector<128xf32>
    %4 = vector.shape_cast %3 : vector<128xf32> to vector<1x128xf32>
    %5 = arith.addf %0, %1 : vector<16x128xf32>
    %cst_3 = arith.constant dense<0.000000e+00> : vector<128xf32>
    %6 = vector.multi_reduction <add>, %5, %cst_3 [0] : vector<16x128xf32> to vector<128xf32>
    %7 = vector.shape_cast %6 : vector<128xf32> to vector<1x128xf32>
    %8 = tpu.concatenate %4, %7 in 0 : vector<1x128xf32>, vector<1x128xf32> -> vector<2x128xf32>
    %9 = vector.shape_cast %8 : vector<2x128xf32> to vector<1x2x128xf32>
    %c0_4 = arith.constant 0 : index
    %c0_5 = arith.constant 0 : index
    %c0_6 = arith.constant 0 : index
    %10 = vector.load %arg3[%c0_4, %c0_5, %c0_6] : memref<1x2x128xf32, #tpu.memory_space<vmem>>, vector<1x2x128xf32>
    tpu.vector_store %arg3[%c0_4, %c0_5, %c0_6], %9 {strides = array<i32>} : memref<1x2x128xf32, #tpu.memory_space<vmem>>, vector<1x2x128xf32>,
    return
  }
  func.func @transform_0(%arg0: i32) -> (i32, i32) {
    %c0_i32 = arith.constant 0 : i32
    %c0_i32_0 = arith.constant 0 : i32
    return %arg0, %c0_i32 : i32, i32
  }
  func.func @transform_1(%arg0: i32) -> (i32, i32) {
    %c0_i32 = arith.constant 0 : i32
    %c0_i32_0 = arith.constant 0 : i32
    return %arg0, %c0_i32 : i32, i32
  }
  func.func @transform_2(%arg0: i32) -> (i32, i32, i32) {
    %c0_i32 = arith.constant 0 : i32
    %c0_i32_0 = arith.constant 0 : i32
    %c0_i32_1 = arith.constant 0 : i32
    return %arg0, %c0_i32, %c0_i32_0 : i32, i32, i32
  }
}

</mosaic_0001>

<bundles_post_ra>
// kernel: tpu_custom_call.1
= control target key start
LH: loop header
LB: loop body
LE: loop exit
PB: predicated region body
PF: predicated region fallthrough
CT: control target
= control target key end

     0   :  { %7 = vsyncpa [#allocation3], 0  ;;  %s214_s0 = inlined_call_operand.hbm [shape: f32[16,128], index: 0, kind: input, shape index: {}]   ;;  %s215_s1 = inlined_call_operand.hbm [shape: f32[16,128], index: 1, kind: input, shape index: {}]   ;;  %s216_s2 = inlined_call_operand.hbm [shape: f32[1,2,128], index: 2, kind: output, shape index: {}]  }
   0x1   :  { %8 = vsyncpa [#allocation6], 0 }
   0x2   :  { %9 = vsyncpa [#allocation4], 0  ;;  %s158_s9 = smov [#allocation2]   ;;  %s86_s13 = scalar_lea.hbm %s214_s0, 256 }
   0x3   :  { %s15_s10 = sshll.u32 %s158_s9, 4  ;;  %p87_p0 = scmp.ne.s32.totalorder %s214_s0, %s86_s13  ;;  %s16_s10 = int_to_ptr.vmem [resolvable:$true] %s15_s10 }
   0x4   :  { %p90_p1 = scmp.lt.u32.totalorder %s86_s13, %s214_s0 }
   0x6   :  { %p92_p2 = pnand %p90_p1, %p87_p0 }
   0x8   :  { %95 = shalt.err (!%p92_p2)
}
   0x9   :  { %s96_s18 = scalar_lea.vmem %s16_s10, 256  ;;  %p101_p4 = scmp.lt.s32.totalorder %s16_s10, %s16_s10 }
   0xa   :  { %p97_p3 = scmp.ne.s32.totalorder %s16_s10, %s96_s18  ;;  %p102_p5 = scmp.lt.s32.totalorder %s96_s18, %s96_s18 }
   0xc   :  { %p103_p6 = por %p102_p5, %p101_p4 }
   0xe   :  { %p104_p7 = pnand %p103_p6, %p97_p3 }
  0x10   :  { %107 = shalt.err (!%p104_p7)
}
  0x11   :  { %s159_s19 = smov 128   ;;  %s160_s20 = smov 8  }
  0x12   :  { %21 = dma.hbm_to_vmem [thread:$0]  %s214_s0, 256, %s16_s10, [#allocation3], %s159_s19, %s159_s19, %s160_s20  }
  0x13   :  { %s161_s23 = smov [#allocation5]   ;;  %s108_s27 = scalar_lea.hbm %s215_s1, 256 }
  0x14   :  { %s27_s24 = sshll.u32 %s161_s23, 4  ;;  %p109_p8 = scmp.ne.s32.totalorder %s215_s1, %s108_s27  ;;  %s28_s24 = int_to_ptr.vmem [resolvable:$true] %s27_s24 }
  0x15   :  { %p112_p9 = scmp.lt.u32.totalorder %s108_s27, %s215_s1 }
  0x17   :  { %p114_p10 = pnand %p112_p9, %p109_p8 }
  0x19   :  { %117 = shalt.err (!%p114_p10)
}
  0x1a   :  { %s118_s4 = scalar_lea.vmem %s28_s24, 256  ;;  %p123_p12 = scmp.lt.s32.totalorder %s28_s24, %s28_s24 }
  0x1b   :  { %p119_p11 = scmp.ne.s32.totalorder %s28_s24, %s118_s4  ;;  %p124_p13 = scmp.lt.s32.totalorder %s118_s4, %s118_s4 }
  0x1d   :  { %p125_p0 = por %p124_p13, %p123_p12 }
  0x1f   :  { %p126_p1 = pnand %p125_p0, %p119_p11 }
  0x21   :  { %129 = shalt.err (!%p126_p1)
}
  0x22   :  { %33 = dma.hbm_to_vmem [thread:$0]  %s215_s1, 256, %s28_s24, [#allocation6], %s159_s19, %s159_s19, %s160_s20  }
  0x23   :  { %152 = dma.done.wait [#allocation3], 256  }
  0x24   :  { %153 = vsyncadd [#allocation3], 4294967040 }
  0x25   :  { %154 = dma.done.wait [#allocation6], 256  }
  0x26   :  { %155 = vsyncadd [#allocation6], 4294967040  ;;  %v40_v0 = vld [vmem:[#allocation2] sm:$0xff]  ;;  %v41_v1 = vld [vmem:[#allocation2 + $0x8] sm:$0xff]  ;;  %s162_s1 = smov [#allocation7]   ;;  %vm62_vm0 = vcmask 1040384  }
  0x27   :  { %v42_v2 = vld [vmem:[#allocation5] sm:$0xff]  ;;  %v43_v3 = vld [vmem:[#allocation5 + $0x8] sm:$0xff]  ;;  %s71_s6 = sshll.u32 %s162_s1, 4  ;;  %s72_s6 = int_to_ptr.vmem [resolvable:$true] %s71_s6 }
  0x28   :  { %v44_v4 = vmul.f32 %v42_v2, %v40_v0  ;;  %v53_v5 = vadd.f32 %v42_v2, %v40_v0  ;;  %v45_v6 = vmul.f32 %v43_v3, %v41_v1  ;;  %v54_v7 = vadd.f32 %v43_v3, %v41_v1  ;;  %s130_s7 = scalar_lea.vmem %s72_s6, 32  ;;  %p135_p3 = scmp.lt.s32.totalorder %s72_s6, %s72_s6 }
  0x29   :  { %p131_p2 = scmp.ne.s32.totalorder %s72_s6, %s130_s7  ;;  %p136_p4 = scmp.lt.s32.totalorder %s130_s7, %s130_s7 }
  0x2a   :  { %v46_v8 = vadd.f32 %v45_v6, %v44_v4  ;;  %v55_v9 = vadd.f32 %v54_v7, %v53_v5 }
  0x2b   :  { %p137_p5 = por %p136_p4, %p135_p3 }
  0x2c   :  { %v47_v10 = vrot.slane %v46_v8, 4  ;;  %v56_v11 = vrot.slane %v55_v9, 4 }
  0x2d   :  { %p138_p6 = pnand %p137_p5, %p131_p2 }
  0x2e   :  { %v48_v12 = vadd.f32 %v47_v10, %v46_v8  ;;  %v57_v13 = vadd.f32 %v56_v11, %v55_v9 }
  0x30   :  { %v49_v14 = vrot.slane %v48_v12, 2  ;;  %v58_v15 = vrot.slane %v57_v13, 2 }
  0x32   :  { %v50_v16 = vadd.f32 %v49_v14, %v48_v12  ;;  %v59_v17 = vadd.f32 %v58_v15, %v57_v13 }
  0x34   :  { %v51_v18 = vrot.slane %v50_v16, 1  ;;  %v60_v19 = vrot.slane %v59_v17, 1 }
  0x36   :  { %v52_v20 = vadd.f32 %v51_v18, %v50_v16  ;;  %v61_v21 = vadd.f32 %v60_v19, %v59_v17 }
  0x38   :  { %v63_v22 = vsel %vm62_vm0, %v52_v20, %v61_v21 }
  0x39   :  { %64 = vst [vmem:[#allocation7] sm:$0x3] %v63_v22 }
  0x3a   :  { %141 = shalt.err (!%p138_p6)
}
  0x3b   :  { %s142_s10 = scalar_lea.hbm %s216_s2, 32 }
  0x3c   :  { %p143_p7 = scmp.ne.s32.totalorder %s216_s2, %s142_s10  ;;  %p146_p8 = scmp.lt.u32.totalorder %s142_s10, %s216_s2 }
  0x3e   :  { %p148_p9 = pnand %p146_p8, %p143_p7 }
  0x40   :  { %151 = shalt.err (!%p148_p9)
}
  0x41   :  { %74 = dma.vmem_to_hbm [thread:$0]  %s72_s6, 32, %s216_s2, [#allocation4]  }
  0x42   :  { %156 = dma.done.wait [#allocation4], 32  }
  0x43   :  { %157 = vsyncadd [#allocation4], 4294967264 }
  0x44   :  { %78 = vsyncpa [#allocation3], 1 }
  0x45   :  { %79 = vsyncpa [#allocation6], 1 }
  0x46   :  { %80 = vsyncpa [#allocation4], 1 }

</bundles_post_ra>
